<compile_context>
chip_gen: v7x
topology: tpu7x:2x2x1
jax: 0.10.0
libtpu: 0.0.40
codegen_flags: <defaults>
</compile_context>

<pallas_src>
import functools

import jax
import jax.numpy as jnp
import numpy as np
from jax import lax
from jax.experimental import pallas as pl
from jax.experimental.pallas import tpu as pltpu

_NEG_BIG = -1e30   # large finite "-inf": exp() underflows to 0, no NaN for fully-masked rows


# ---------------------------------------------------------------------------
# small helpers
# ---------------------------------------------------------------------------
def _pick_hd_tile(hd):
    """Largest lane-aligned tile (<=512, multiple of 128) dividing HD, else HD itself."""
    for t in (512, 384, 256, 128):
        if hd % t == 0:
            return t
    return hd


def _vmem_limit_bytes():
    """Leave headroom below physical VMEM (never budget the full 64 MiB on v7x)."""
    try:
        cap = pltpu.get_tpu_info().vmem_capacity_bytes
    except Exception:
        return None                                      # fall back to compiler default
    return int(min(100 * 1024 * 1024, cap * 3 // 4))     # ~100 MiB v5e/v6e, ~48 MiB v7x


# ---------------------------------------------------------------------------
# Host-side (hoistable) parameter / mask preparation
# ---------------------------------------------------------------------------
def prepare_params(w_ln, wq, wk, wv, wo, *, num_heads, dim_head):
    """One-time weight layout/dtype prep (keep OUT of the per-step forward path)."""
    d_model = wq.shape[1]
    return dict(
        w_ln=w_ln.astype(jnp.float32).reshape(1, d_model),          # (1, D)
        wq_t=wq.T.astype(jnp.bfloat16),                             # (D, HD)
        wk_t=wk.T.astype(jnp.bfloat16),                             # (D, HD)
        wv_t=wv.T.astype(jnp.bfloat16),                             # (D, HD)
        wo_r=wo.T.reshape(num_heads, dim_head, d_model).astype(jnp.bfloat16),  # (H, dh, D)
    )


def prepare_mask(mask, *, q_block=256, kv_block=256):
    """int8 mask (4x less DMA than fp32) + per-(q-tile, kv-tile) validity table."""
    B, S, _ = mask.shape
    tq = S if S <= q_block else q_block
    tk = S if S <= kv_block else kv_block
    assert S % tq == 0 and S % tk == 0, "seq length must be divisible by the tiles"
    nq, nk = S // tq, S // tk
    mask_i8 = (mask != 0).astype(jnp.int8)
    tiles = mask_i8.reshape(B, nq, tq, nk, tk)
    tile_valid = (tiles.max(axis=(2, 4)) > 0).astype(jnp.int32).reshape(-1)  # (B*nq*nk,)
    return mask_i8, tile_valid


# ---------------------------------------------------------------------------
# Kernel A: RMS LayerNorm + fused Q/K/V projection.
# grid = (batch, q-tiles, HD-tiles); weights streamed in (D, tn) blocks.
# ---------------------------------------------------------------------------
def _ln_qkv_kernel(h_ref, wln_ref, wqt_ref, wkt_ref, wvt_ref,
                   q_ref, k_ref, v_ref, *, eps):
    x = h_ref[0].astype(jnp.float32)                        # (tq, D)
    var = jnp.mean(x * x, axis=-1, keepdims=True)
    xn = ((x * lax.rsqrt(var + eps)) * wln_ref[0]).astype(jnp.bfloat16)
    # Weights arrive pre-transposed (D, tn): plain matmuls, fp32 accumulation on the MXU.
    q_ref[0] = jnp.dot(xn, wqt_ref[...],
                       preferred_element_type=jnp.float32).astype(jnp.bfloat16)
    k_ref[0] = jnp.dot(xn, wkt_ref[...],
                       preferred_element_type=jnp.float32).astype(jnp.bfloat16)
    v_ref[0] = jnp.dot(xn, wvt_ref[...],
                       preferred_element_type=jnp.float32).astype(jnp.bfloat16)


# ---------------------------------------------------------------------------
# Kernel B: flash attention with heads on the grid + per-head fold into W_o + residual.
# grid = (batch, q-tiles, heads, kv-tiles); kv axis is the online-softmax reduction,
# head axis is the output-projection reduction.
# ---------------------------------------------------------------------------
def _flash_attn_kernel(valid_ref,                            # scalar-prefetch (SMEM)
                       res_ref, m_ref, q_ref, k_ref, v_ref, wo_ref,
                       o_ref,
                       m_scr, l_scr, acc_scr, out_scr):
    b = pl.program_id(0)
    qi = pl.program_id(1)
    h = pl.program_id(2)
    ki = pl.program_id(3)
    nq = pl.num_programs(1)
    nh = pl.num_programs(2)
    nk = pl.num_programs(3)

    @pl.when(ki == 0)
    def _init_head():
        m_scr[...] = jnp.full(m_scr.shape, _NEG_BIG, m_scr.dtype)
        l_scr[...] = jnp.zeros_like(l_scr)
        acc_scr[...] = jnp.zeros_like(acc_scr)

    # Skip fully-masked (q-tile, kv-tile) pairs entirely (no MXU / EUP work).
    valid = valid_ref[(b * nq + qi) * nk + ki] > 0

    @pl.when(valid)
    def _tile():
        q = q_ref[0, 0]                                      # (tq, dh) bf16
        k = k_ref[0, 0]                                      # (tk, dh) bf16
        mask = m_ref[0] != 0                                 # (tq, tk) bool
        # q @ k^T without an explicit transpose (contract the head dims).
        s = lax.dot_general(q, k, (((1,), (1,)), ((), ())),
                            preferred_element_type=jnp.float32)   # (tq, tk) fp32
        # attn_scale=False (module default) -> no 1/sqrt(dim_head)
        s = jnp.where(mask, s, _NEG_BIG)

        m_prev = m_scr[...]                                  # (tq, 1)
        m_new = jnp.maximum(m_prev, jnp.max(s, axis=-1, keepdims=True))
        alpha = jnp.exp(m_prev - m_new)
        p = jnp.exp(s - m_new)
        p = jnp.where(mask, p, 0.0)                          # numerator mask == post-softmax fill

        l_scr[...] = alpha * l_scr[...] + jnp.sum(p, axis=-1, keepdims=True)
        acc_scr[...] = alpha * acc_scr[...] + jnp.dot(
            p.astype(jnp.bfloat16), v_ref[0, 0], preferred_element_type=jnp.float32)
        m_scr[...] = m_new

    @pl.when(ki == nk - 1)
    def _head_done():
        l = l_scr[...]
        # EUP reciprocal; 0 for fully-masked query rows (matches torch masked_fill behavior)
        inv = jnp.where(l > 0.0, pl.reciprocal(l, approx=True), 0.0)
        o_h = (acc_scr[...] * inv).astype(jnp.bfloat16)      # (tq, dh)
        # fold head h straight into the head-major output projection (dynamic leading index)
        contrib = jnp.dot(o_h, wo_ref[h], preferred_element_type=jnp.float32)  # (tq, D)

        @pl.when(h == 0)
        def _first_head():
            out_scr[...] = res_ref[0].astype(jnp.float32) + contrib   # residual added once

        @pl.when(h != 0)
        def _other_heads():
            out_scr[...] = out_scr[...] + contrib

        @pl.when(h == nh - 1)
        def _store():
            o_ref[0] = out_scr[...].astype(o_ref.dtype)      # single lane-dense store


# ---------------------------------------------------------------------------
# Forward wrapper
# ---------------------------------------------------------------------------
def self_attention_block(hidden, mask_i8, tile_valid, params, *,
                         num_heads, dim_head, eps=1e-5,
                         q_block=256, kv_block=256):
    """Forward of model_center SelfAttentionBlock (pre-LN, no bias, no attn scale)."""
    B, S, D = hidden.shape
    HD = num_heads * dim_head

    tq = S if S <= q_block else q_block
    tk = S if S <= kv_block else kv_block
    assert S % tq == 0 and S % tk == 0, "seq length must be divisible by the tiles"
    nq, nk = S // tq, S // tk
    assert tile_valid.shape[0] == B * nq * nk, "tile_valid must match (q_block, kv_block)"

    tn = _pick_hd_tile(HD)
    vmem_limit = _vmem_limit_bytes()

    # ---- kernel A: LayerNorm + QKV projection, tiled over (batch, seq, HD) ----
    qkv_out_spec = pl.BlockSpec((1, tq, tn), lambda b, i, j: (b, i, j))
    qkv_shape = jax.ShapeDtypeStruct((B, S, HD), jnp.bfloat16)
    q, k, v = pl.pallas_call(
        functools.partial(_ln_qkv_kernel, eps=eps),
        out_shape=(qkv_shape, qkv_shape, qkv_shape),
        grid_spec=pltpu.PrefetchScalarGridSpec(
            num_scalar_prefetch=0,
            grid=(B, S // tq, HD // tn),
            in_specs=[
                pl.BlockSpec((1, tq, D), lambda b, i, j: (b, i, 0)),   # hidden
                pl.BlockSpec((1, D),     lambda b, i, j: (0, 0)),      # layernorm weight
                pl.BlockSpec((D, tn),    lambda b, i, j: (0, j)),      # W_q^T block
                pl.BlockSpec((D, tn),    lambda b, i, j: (0, j)),      # W_k^T block
                pl.BlockSpec((D, tn),    lambda b, i, j: (0, j)),      # W_v^T block
            ],
            out_specs=(qkv_out_spec, qkv_out_spec, qkv_out_spec),
        ),
        compiler_params=pltpu.CompilerParams(
            dimension_semantics=("parallel", "parallel", "parallel"),
            vmem_limit_bytes=vmem_limit),
    )(hidden, params["w_ln"], params["wq_t"], params["wk_t"], params["wv_t"])

    # Head-major layout so every per-head block in the attention kernel is
    # (8,128)-tile aligned (review: avoid lane-offset head slicing when dim_head < 128).
    q4 = jnp.transpose(q.reshape(B, S, num_heads, dim_head), (0, 2, 1, 3))
    k4 = jnp.transpose(k.reshape(B, S, num_heads, dim_head), (0, 2, 1, 3))
    v4 = jnp.transpose(v.reshape(B, S, num_heads, dim_head), (0, 2, 1, 3))

    # ---- kernel B: flash attention + output projection + residual ----
    out = pl.pallas_call(
        _flash_attn_kernel,
        out_shape=jax.ShapeDtypeStruct((B, S, D), hidden.dtype),
        grid_spec=pltpu.PrefetchScalarGridSpec(
            num_scalar_prefetch=1,                           # tile-validity table (SMEM)
            grid=(B, nq, num_heads, nk),
            in_specs=[
                pl.BlockSpec((1, tq, D),  lambda b, qi, h, ki, tv: (b, qi, 0)),   # residual
                pl.BlockSpec((1, tq, tk), lambda b, qi, h, ki, tv: (b, qi, ki)),  # mask int8
                pl.BlockSpec((1, 1, tq, dim_head), lambda b, qi, h, ki, tv: (b, h, qi, 0)),  # q
                pl.BlockSpec((1, 1, tk, dim_head), lambda b, qi, h, ki, tv: (b, h, ki, 0)),  # k
                pl.BlockSpec((1, 1, tk, dim_head), lambda b, qi, h, ki, tv: (b, h, ki, 0)),  # v
                pl.BlockSpec((num_heads, dim_head, D), lambda b, qi, h, ki, tv: (0, 0, 0)),  # W_o
            ],
            out_specs=pl.BlockSpec((1, tq, D), lambda b, qi, h, ki, tv: (b, qi, 0)),
            scratch_shapes=[
                pltpu.VMEM((tq, 1), jnp.float32),            # running max   (per current head)
                pltpu.VMEM((tq, 1), jnp.float32),            # running denom (per current head)
                pltpu.VMEM((tq, dim_head), jnp.float32),     # running numerator
                pltpu.VMEM((tq, D), jnp.float32),            # fp32 output accumulator (lane dense)
            ],
        ),
        compiler_params=pltpu.CompilerParams(
            # (batch, q-tile) are megacore-parallel; head & kv axes carry reductions.
            dimension_semantics=("parallel", "parallel", "arbitrary", "arbitrary"),
            vmem_limit_bytes=vmem_limit),
    )(tile_valid, hidden, mask_i8, q4, k4, v4, params["wo_r"])
    return out


# ---------------------------------------------------------------------------
# Pure-JAX fp32 reference (mirrors the PyTorch module) + demo
# ---------------------------------------------------------------------------
def _reference(hidden, mask, w_ln, wq, wk, wv, wo, *, num_heads, dim_head, eps=1e-5):
    B, S, D = hidden.shape
    xf = hidden.astype(jnp.float32)
    var = jnp.mean(xf * xf, axis=-1, keepdims=True)
    xn = (xf * lax.rsqrt(var + eps)) * w_ln
    q = xn @ wq.T
    k = xn @ wk.T
    v = xn @ wv.T
    q = q.reshape(B, S, num_heads, dim_head).transpose(0, 2, 1, 3)
    k = k.reshape(B, S, num_heads, dim_head).transpose(0, 2, 1, 3)
    v = v.reshape(B, S, num_heads, dim_head).transpose(0, 2, 1, 3)
    score = jnp.einsum('bhqd,bhkd->bhqk', q, k)
    m = (mask > 0)[:, None, :, :]
    score = jnp.where(m, score, -jnp.inf)
    score = jax.nn.softmax(score, axis=-1)
    score = jnp.where(m, score, 0.0)
    out = jnp.einsum('bhqk,bhkd->bhqd', score, v)
    out = out.transpose(0, 2, 1, 3).reshape(B, S, num_heads * dim_head)
    out = out @ wo.T
    return hidden + out


if __name__ == "__main__":
    # Small shapes consistent with the module signature.
    B, S = 2, 8
    dim_model, num_heads, dim_head = 32, 4, 8
    HD = num_heads * dim_head

    key = jax.random.PRNGKey(0)
    k_h, k_q, k_k, k_v, k_o = jax.random.split(key, 5)

    hidden = jax.random.normal(k_h, (B, S, dim_model), dtype=jnp.float32)
    # Causal mask (every query row has at least one valid key).
    mask = jnp.broadcast_to(jnp.tril(jnp.ones((S, S), jnp.float32)), (B, S, S))

    # Deterministic parameter init (Attention: normal(0, 0.02); LayerNorm: init_var=1.0).
    init_std = 0.02
    w_ln = jnp.ones((dim_model,), jnp.float32)
    wq = init_std * jax.random.normal(k_q, (HD, dim_model), dtype=jnp.float32)
    wk = init_std * jax.random.normal(k_k, (HD, dim_model), dtype=jnp.float32)
    wv = init_std * jax.random.normal(k_v, (HD, dim_model), dtype=jnp.float32)
    wo = init_std * jax.random.normal(k_o, (dim_model, HD), dtype=jnp.float32)

    # One-time (hoistable) prep of weights and mask.
    params = prepare_params(w_ln, wq, wk, wv, wo, num_heads=num_heads, dim_head=dim_head)
    mask_i8, tile_valid = prepare_mask(mask, q_block=256, kv_block=256)

    out = self_attention_block(hidden, mask_i8, tile_valid, params,
                               num_heads=num_heads, dim_head=dim_head, eps=1e-5,
                               q_block=256, kv_block=256)
    out = jax.block_until_ready(out)

    ref = _reference(hidden, mask, w_ln, wq, wk, wv, wo,
                     num_heads=num_heads, dim_head=dim_head, eps=1e-5)
    # bf16 MXU operands (matching the module's half-precision default) => slightly
    # looser tolerance than a pure-fp32 comparison.
    np.testing.assert_allclose(np.asarray(out), np.asarray(ref), rtol=5e-3, atol=5e-3)

    print("KERNEL_OK")
</pallas_src>

<mosaic_0001>
module attributes {stable_mosaic.version = 11 : i64} {
  func.func @_ln_qkv_kernel(%arg0: i32, %arg1: i32, %arg2: i32, %arg3: memref<1x8x32xf32, #tpu.memory_space<vmem>>, %arg4: memref<1x32xf32, #tpu.memory_space<vmem>>, %arg5: memref<32x32xbf16, #tpu.memory_space<vmem>>, %arg6: memref<32x32xbf16, #tpu.memory_space<vmem>>, %arg7: memref<32x32xbf16, #tpu.memory_space<vmem>>, %arg8: memref<1x8x32xbf16, #tpu.memory_space<vmem>>, %arg9: memref<1x8x32xbf16, #tpu.memory_space<vmem>>, %arg10: memref<1x8x32xbf16, #tpu.memory_space<vmem>>) attributes {dimension_semantics = [#tpu.dimension_semantics<parallel>, #tpu.dimension_semantics<parallel>, #tpu.dimension_semantics<parallel>], iteration_bounds = array<i64: 2, 1, 1>, scalar_prefetch = 0 : i64, scratch_operands = 0 : i64, tpu.core_type = #tpu.core_type<tc>, window_params = [{transform_indices = @transform_0, window_bounds = array<i64: 1, 8, 32>}, {pipeline_mode = #tpu.pipeline_mode<synchronous>, transform_indices = @transform_1, window_bounds = array<i64: 1, 32>}, {transform_indices = @transform_2, window_bounds = array<i64: 32, 32>}, {transform_indices = @transform_3, window_bounds = array<i64: 32, 32>}, {transform_indices = @transform_4, window_bounds = array<i64: 32, 32>}, {transform_indices = @transform_5, window_bounds = array<i64: 1, 8, 32>}, {transform_indices = @transform_6, window_bounds = array<i64: 1, 8, 32>}, {transform_indices = @transform_7, window_bounds = array<i64: 1, 8, 32>}]} {
    %c0 = arith.constant 0 : index
    %c0_0 = arith.constant 0 : index
    %c0_1 = arith.constant 0 : index
    %0 = vector.load %arg3[%c0, %c0_0, %c0_1] : memref<1x8x32xf32, #tpu.memory_space<vmem>>, vector<1x8x32xf32>
    %1 = vector.shape_cast %0 : vector<1x8x32xf32> to vector<8x32xf32>
    %2 = arith.mulf %1, %1 : vector<8x32xf32>
    %cst = arith.constant dense<0.000000e+00> : vector<8xf32>
    %3 = vector.multi_reduction <add>, %2, %cst [1] : vector<8x32xf32> to vector<8xf32>
    %4 = vector.shape_cast %3 : vector<8xf32> to vector<8x1xf32>
    %cst_2 = arith.constant 3.200000e+01 : f32
    %5 = vector.broadcast %cst_2 : f32 to vector<8x1xf32>
    %6 = arith.divf %4, %5 : vector<8x1xf32>
    %cst_3 = arith.constant 9.99999974E-6 : f32
    %7 = vector.broadcast %cst_3 : f32 to vector<8x1xf32>
    %8 = arith.addf %6, %7 : vector<8x1xf32>
    %9 = math.rsqrt %8 : vector<8x1xf32>
    %10 = vector.broadcast %9 : vector<8x1xf32> to vector<8x32xf32>
    %11 = arith.mulf %1, %10 : vector<8x32xf32>
    %c0_4 = arith.constant 0 : index
    %c0_5 = arith.constant 0 : index
    %12 = vector.load %arg4[%c0_4, %c0_5] : memref<1x32xf32, #tpu.memory_space<vmem>>, vector<1x32xf32>
    %13 = vector.shape_cast %12 : vector<1x32xf32> to vector<32xf32>
    %14 = vector.shape_cast %13 : vector<32xf32> to vector<1x32xf32>
    %15 = vector.broadcast %14 : vector<1x32xf32> to vector<8x32xf32>
    %16 = arith.mulf %11, %15 : vector<8x32xf32>
    %17 = arith.truncf %16 : vector<8x32xf32> to vector<8x32xbf16>
    %c0_6 = arith.constant 0 : index
    %c0_7 = arith.constant 0 : index
    %18 = vector.load %arg5[%c0_6, %c0_7] : memref<32x32xbf16, #tpu.memory_space<vmem>>, vector<32x32xbf16>
    %cst_8 = arith.constant dense<0.000000e+00> : vector<8x32xf32>
    %19 = tpu.matmul %17, %18, %cst_8 {dimension_numbers = #tpu.dot_dimension_numbers<[1], [0], [0], [1], [0, 0, 1, 1], [], []>} : vector<8x32xbf16>, vector<32x32xbf16>, vector<8x32xf32> -> vector<8x32xf32>
    %20 = arith.truncf %19 : vector<8x32xf32> to vector<8x32xbf16>
    %c0_9 = arith.constant 0 : index
    %c0_10 = arith.constant 0 : index
    %c0_11 = arith.constant 0 : index
    %21 = vector.load %arg8[%c0_9, %c0_10, %c0_11] : memref<1x8x32xbf16, #tpu.memory_space<vmem>>, vector<1x8x32xbf16>
    %22 = vector.shape_cast %21 : vector<1x8x32xbf16> to vector<8x32xbf16>
    %23 = vector.shape_cast %20 : vector<8x32xbf16> to vector<1x8x32xbf16>
    tpu.vector_store %arg8[%c0_9, %c0_10, %c0_11], %23 {strides = array<i32>} : memref<1x8x32xbf16, #tpu.memory_space<vmem>>, vector<1x8x32xbf16>,
    %c0_12 = arith.constant 0 : index
    %c0_13 = arith.constant 0 : index
    %24 = vector.load %arg6[%c0_12, %c0_13] : memref<32x32xbf16, #tpu.memory_space<vmem>>, vector<32x32xbf16>
    %cst_14 = arith.constant dense<0.000000e+00> : vector<8x32xf32>
    %25 = tpu.matmul %17, %24, %cst_14 {dimension_numbers = #tpu.dot_dimension_numbers<[1], [0], [0], [1], [0, 0, 1, 1], [], []>} : vector<8x32xbf16>, vector<32x32xbf16>, vector<8x32xf32> -> vector<8x32xf32>
    %26 = arith.truncf %25 : vector<8x32xf32> to vector<8x32xbf16>
    %c0_15 = arith.constant 0 : index
    %c0_16 = arith.constant 0 : index
    %c0_17 = arith.constant 0 : index
    %27 = vector.load %arg9[%c0_15, %c0_16, %c0_17] : memref<1x8x32xbf16, #tpu.memory_space<vmem>>, vector<1x8x32xbf16>
    %28 = vector.shape_cast %27 : vector<1x8x32xbf16> to vector<8x32xbf16>
    %29 = vector.shape_cast %26 : vector<8x32xbf16> to vector<1x8x32xbf16>
    tpu.vector_store %arg9[%c0_15, %c0_16, %c0_17], %29 {strides = array<i32>} : memref<1x8x32xbf16, #tpu.memory_space<vmem>>, vector<1x8x32xbf16>,
    %c0_18 = arith.constant 0 : index
    %c0_19 = arith.constant 0 : index
    %30 = vector.load %arg7[%c0_18, %c0_19] : memref<32x32xbf16, #tpu.memory_space<vmem>>, vector<32x32xbf16>
    %cst_20 = arith.constant dense<0.000000e+00> : vector<8x32xf32>
    %31 = tpu.matmul %17, %30, %cst_20 {dimension_numbers = #tpu.dot_dimension_numbers<[1], [0], [0], [1], [0, 0, 1, 1], [], []>} : vector<8x32xbf16>, vector<32x32xbf16>, vector<8x32xf32> -> vector<8x32xf32>
    %32 = arith.truncf %31 : vector<8x32xf32> to vector<8x32xbf16>
    %c0_21 = arith.constant 0 : index
    %c0_22 = arith.constant 0 : index
    %c0_23 = arith.constant 0 : index
    %33 = vector.load %arg10[%c0_21, %c0_22, %c0_23] : memref<1x8x32xbf16, #tpu.memory_space<vmem>>, vector<1x8x32xbf16>
    %34 = vector.shape_cast %33 : vector<1x8x32xbf16> to vector<8x32xbf16>
    %35 = vector.shape_cast %32 : vector<8x32xbf16> to vector<1x8x32xbf16>
    tpu.vector_store %arg10[%c0_21, %c0_22, %c0_23], %35 {strides = array<i32>} : memref<1x8x32xbf16, #tpu.memory_space<vmem>>, vector<1x8x32xbf16>,
    return
  }
  func.func @transform_0(%arg0: i32, %arg1: i32, %arg2: i32) -> (i32, i32, i32) {
    %c0_i32 = arith.constant 0 : i32
    %c0_i32_0 = arith.constant 0 : i32
    return %arg0, %arg1, %c0_i32 : i32, i32, i32
  }
  func.func @transform_1(%arg0: i32, %arg1: i32, %arg2: i32) -> (i32, i32) {
    %c0_i32 = arith.constant 0 : i32
    %c0_i32_0 = arith.constant 0 : i32
    %c0_i32_1 = arith.constant 0 : i32
    return %c0_i32, %c0_i32_0 : i32, i32
  }
  func.func @transform_2(%arg0: i32, %arg1: i32, %arg2: i32) -> (i32, i32) {
    %c0_i32 = arith.constant 0 : i32
    %c0_i32_0 = arith.constant 0 : i32
    return %c0_i32, %arg2 : i32, i32
  }
  func.func @transform_3(%arg0: i32, %arg1: i32, %arg2: i32) -> (i32, i32) {
    %c0_i32 = arith.constant 0 : i32
    %c0_i32_0 = arith.constant 0 : i32
    return %c0_i32, %arg2 : i32, i32
  }
  func.func @transform_4(%arg0: i32, %arg1: i32, %arg2: i32) -> (i32, i32) {
    %c0_i32 = arith.constant 0 : i32
    %c0_i32_0 = arith.constant 0 : i32
    return %c0_i32, %arg2 : i32, i32
  }
  func.func @transform_5(%arg0: i32, %arg1: i32, %arg2: i32) -> (i32, i32, i32) {
    %c0_i32 = arith.constant 0 : i32
    return %arg0, %arg1, %arg2 : i32, i32, i32
  }
  func.func @transform_6(%arg0: i32, %arg1: i32, %arg2: i32) -> (i32, i32, i32) {
    %c0_i32 = arith.constant 0 : i32
    return %arg0, %arg1, %arg2 : i32, i32, i32
  }
  func.func @transform_7(%arg0: i32, %arg1: i32, %arg2: i32) -> (i32, i32, i32) {
    %c0_i32 = arith.constant 0 : i32
    return %arg0, %arg1, %arg2 : i32, i32, i32
  }
}

</mosaic_0001>

<bundles_post_ra>
// kernel: tpu_custom_call.1
= control target key start
LH: loop header
LB: loop body
LE: loop exit
PB: predicated region body
PF: predicated region fallthrough
CT: control target
= control target key end

     0   :  { %s1719_s0 = inlined_call_operand.hbm [shape: f32[2,8,32], index: 0, kind: input, shape index: {}]   ;;  %s1720_s1 = inlined_call_operand.vmem [shape: f32[1,32], index: 1, kind: input, shape index: {}]   ;;  %s1721_s2 = inlined_call_operand.hbm [shape: bf16[32,32], index: 2, kind: input, shape index: {}]   ;;  %s1722_s3 = inlined_call_operand.hbm [shape: bf16[32,32], index: 3, kind: input, shape index: {}]   ;;  %s1723_s4 = inlined_call_operand.hbm [shape: bf16[32,32], index: 4, kind: input, shape index: {}]   ;;  %s1724_s5 = inlined_call_operand.hbm [shape: bf16[2,8,32], index: 5, kind: output, shape index: {0}]   ;;  %s1725_s6 = inlined_call_operand.hbm [shape: bf16[2,8,32], index: 6, kind: output, shape index: {1}]   ;;  %s1726_s7 = inlined_call_operand.hbm [shape: bf16[2,8,32], index: 7, kind: output, shape index: {2}]  }
   0x1   :  { %1734 = sst [smem:[#allocation21_spill]] %s1726_s7 }
   0x2   :  { %13 = vsyncpa [#allocation3], 0 }
   0x3   :  { %15 = vsyncpa [#allocation3 + $0x1], 0 }
   0x4   :  { %16 = vsyncpa [#allocation6], 0 }
   0x5   :  { %17 = vsyncpa [#allocation9], 0 }
   0x6   :  { %18 = vsyncpa [#allocation4], 0 }
   0x7   :  { %20 = vsyncpa [#allocation4 + $0x1], 0 }
   0x8   :  { %21 = vsyncpa [#allocation12], 0 }
   0x9   :  { %23 = vsyncpa [#allocation12 + $0x1], 0  ;;  %s1350_s24 = smov 0   ;;  %s1352_s25 = smov 0  }
   0xa   :  { %s1354_s26 = smov 0   ;;  %s1356_s27 = smov 0  }
   0xb   :  { %s1358_s28 = smov 0   ;;  %s1360_s29 = smov 0  }
   0xc LB: > { %1735 = sst [smem:[#allocation19_spill]] %s1277_s24  ;;  %s1381_s30 = sadd.s32 4294967295, %s1297_s29   ;;  %s1297_s29 = sphi %s1360_s29, %s29_s29   ;;  %s1293_s28 = sphi %s1358_s28, %s1761_s28   ;;  %s1289_s27 = sphi %s1356_s27, %s1760_s27   ;;  %s1285_s26 = sphi %s1354_s26, %s1759_s26   ;;  %s1281_s25 = sphi %s1352_s25, %s1758_s25   ;;  %s1277_s24 = sphi %s1350_s24, %s1757_s24  }
   0xd   : > { %s1728_s8 = sadd.s32 4294967294, %s1297_s29   ;;  %p70_p0 = scmp.ne.s32.totalorder %s1281_s25, %s1277_s24 }
   0xe   : > { %p1727_p1 = scmp.eq.s32.totalorder %s1381_s30, 0  ;;  %p203_p3 = scmp.eq.s32.totalorder %s1728_s8, 1 }
   0xf   : > { %p852_p5 = scmp.ge.s32.totalorder %s1297_s29, 1  ;;  %p270_p7 = scmp.lt.s32.totalorder %s1297_s29, 3 }
  0x10   : > { %p1392_p4 = por %p1727_p1, %p70_p0  ;;  %p1397_p6 = por %p203_p3, %p70_p0 }
  0x11   : > { %p1402_p8 = pnand %p852_p5, %p270_p7  ;;  %s1299_s12 = smov [#allocation5]  }
  0x12   : > { %s1736_s9 = scalar_select %p1392_p4, 1, 0 }
  0x13   : > { %s1737_s10 = scalar_select %p1397_p6, 1, 0 }
  0x14   : > { %s1739_s11 = scalar_select %p1402_p8, 1, 0 }
  0x15   : > { %1738 = sst [smem:[#allocation20_spill]] %s1737_s10  ;;  %s287_s13 = sshll.u32 %s1299_s12, 4  ;;  %s1406_s13 = int_to_ptr.vmem [resolvable:$true] %s287_s13 }
  0x16   : > { %p938_p9 = pneg %p1402_p8  ;;  %s1300_s15 = smov [#allocation7]  }
  0x17   : > { %s302_s16 = sshll.u32 %s1300_s15, 4  ;;  %s1301_s17 = smov [#allocation8]   ;;  %s1417_s16 = int_to_ptr.vmem [resolvable:$true] %s302_s16 }
  0x18   : > { %p1413_p11 = pnand %p938_p9, %p1727_p1  ;;  %s1419_s18 = sshll.u32 %s1301_s17, 4  ;;  %s318_s18 = int_to_ptr.vmem [resolvable:$true] %s1419_s18 }
  0x19   : > { %s1033_s21 = scalar_lea.hbm %s1721_s2, 256 }
  0x1a   : > { %p1034_p12 = scmp.ne.s32.totalorder %s1721_s2, %s1033_s21  ;;  %p1429_p13 = pneg %p1413_p11 }
  0x1b   : > { %p1040_p5 = scmp.lt.u32.totalorder %s1033_s21, %s1721_s2 }
  0x1c   : > { %p1036_p0 = pnand %p1429_p13, %p1034_p12 }
  0x1e   : > { %p1037_p3 = pneg %p1036_p0 }
  0x20   : > { %p1042_p7 = pnand %p1040_p5, %p1037_p3 }
  0x22   : > { %1045 = shalt.err (!%p1042_p7)
}
  0x23   : > { %s1046_s19 = scalar_lea.vmem %s1406_s13, 256  ;;  %p1054_p2 = scmp.lt.s32.totalorder %s1406_s13, %s1406_s13 }
  0x24   : > { %p1047_p9 = scmp.ne.s32.totalorder %s1406_s13, %s1046_s19  ;;  %p1055_p6 = scmp.lt.s32.totalorder %s1046_s19, %s1046_s19 }
  0x26   : > { %p1049_p10 = pnand %p1047_p9, %p1429_p13  ;;  %p1056_p12 = por %p1055_p6, %p1054_p2 }
  0x28   : > { %p1050_p1 = pneg %p1049_p10 }
  0x2a   : > { %p1057_p0 = pnand %p1056_p12, %p1050_p1 }
  0x2c   : > { %1060 = shalt.err (!%p1057_p0)
}
  0x2d   : > { %s1302_s20 = smov 64   ;;  %s1303_s21 = smov 4  }
  0x2e   : > { %941 = dma.hbm_to_vmem [thread:$0]  (!%p1413_p11), %s1721_s2, 256, %s1406_s13, [#allocation6], %s1302_s20, %s1302_s20, %s1303_s21  }
  0x2f   : > { %s1061_s19 = scalar_lea.hbm %s1722_s3, 256 }
  0x30   : > { %p1062_p1 = scmp.ne.s32.totalorder %s1722_s3, %s1061_s19  ;;  %p1068_p10 = scmp.lt.u32.totalorder %s1061_s19, %s1722_s3 }
  0x32   : > { %p1064_p2 = pnand %p1062_p1, %p1429_p13 }
  0x34   : > { %p1065_p6 = pneg %p1064_p2 }
  0x36   : > { %p1070_p3 = pnand %p1068_p10, %p1065_p6 }
  0x38   : > { %1073 = shalt.err (!%p1070_p3)
}
  0x39   : > { %s1074_s13 = scalar_lea.vmem %s1417_s16, 256  ;;  %p1082_p12 = scmp.lt.s32.totalorder %s1417_s16, %s1417_s16 }
  0x3a   : > { %p1075_p5 = scmp.ne.s32.totalorder %s1417_s16, %s1074_s13  ;;  %p1083_p0 = scmp.lt.s32.totalorder %s1074_s13, %s1074_s13 }
  0x3c   : > { %p1077_p7 = pnand %p1075_p5, %p1429_p13  ;;  %p1084_p1 = por %p1083_p0, %p1082_p12 }
  0x3e   : > { %p1078_p9 = pneg %p1077_p7 }
  0x40   : > { %p1085_p2 = pnand %p1084_p1, %p1078_p9 }
  0x42   : > { %1088 = shalt.err (!%p1085_p2)
}
  0x43   : > { %944 = dma.hbm_to_vmem [thread:$0]  (!%p1413_p11), %s1722_s3, 256, %s1417_s16, [#allocation6], %s1302_s20, %s1302_s20, %s1303_s21  }
  0x44   : > { %s1089_s22 = scalar_lea.hbm %s1723_s4, 256 }
  0x45   : > { %p1090_p6 = scmp.ne.s32.totalorder %s1723_s4, %s1089_s22  ;;  %p1096_p5 = scmp.lt.u32.totalorder %s1089_s22, %s1723_s4 }
  0x47   : > { %p1092_p10 = pnand %p1090_p6, %p1429_p13 }
  0x49   : > { %p1093_p3 = pneg %p1092_p10 }
  0x4b   : > { %p1098_p7 = pnand %p1096_p5, %p1093_p3 }
  0x4d   : > { %1101 = shalt.err (!%p1098_p7)
}
  0x4e   : > { %s1102_s13 = scalar_lea.vmem %s318_s18, 256  ;;  %p1110_p1 = scmp.lt.s32.totalorder %s318_s18, %s318_s18 }
  0x4f   : > { %p1103_p9 = scmp.ne.s32.totalorder %s318_s18, %s1102_s13  ;;  %p1111_p2 = scmp.lt.s32.totalorder %s1102_s13, %s1102_s13 }
  0x51   : > { %p1105_p12 = pnand %p1103_p9, %p1429_p13  ;;  %p1112_p4 = por %p1111_p2, %p1110_p1 }
  0x53   : > { %p1106_p0 = pneg %p1105_p12 }
  0x55   : > { %p1113_p8 = pnand %p1112_p4, %p1106_p0 }
  0x57   : > { %1116 = shalt.err (!%p1113_p8)
}
  0x58   : > { %947 = dma.hbm_to_vmem [thread:$0]  (!%p1413_p11), %s1723_s4, 256, %s318_s18, [#allocation9], %s1302_s20, %s1302_s20, %s1303_s21  }
  0x59   : > { %s57_s12 = sadd.s32 1, %s1285_s26  ;;  %s48_s14 = sadd.s32 1, %s1293_s28 }
  0x5a   : > { %p64_p4 = scmp.ne.s32.totalorder %s1285_s26, %s1281_s25  ;;  %p50_p8 = scmp.ge.s32.totalorder %s48_s14, 2 }
  0x5b   : > { %p65_p13 = scmp.eq.s32.totalorder %s1297_s29, 0  ;;  %p1742_p6 = scmp.eq.s32.totalorder %s1381_s30, 1 }
  0x5c   : > { %p965_p3 = scmp.lt.s32.totalorder %s1297_s29, 2  ;;  %s1763_s14 = smov (%p50_p8, %s48_s14), 0 }
  0x5d   : > { %p1508_p10 = por %p1742_p6, %p64_p4  ;;  %p66_p5 = por %p65_p13, %p64_p4 }
  0x5e   : > { %s331_s8 = sand.u32 1, %s1285_s26   ;;  %s52_s10 = ssub.s32 %s1293_s28, %s1763_s14 }
  0x5f   : > { %p55_p7 = scmp.eq.s32.totalorder %s52_s10, 0  ;;  %s857_s18 = sshll.u32 %s331_s8, 3 }
  0x60   : > { %s858_s20 = sshll.u32 %s1293_s28, 7  ;;  %s335_s17 = scalar_lea.vmem [#allocation2], %s857_s18 }
  0x61   : > { %s1520_s21 = scalar_select %p55_p7, %s1285_s26, %s57_s12  }
  0x62   : > { %s1525_s15 = scalar_lea.hbm %s1719_s0, %s858_s20  ;;  %s343_s19 = sshll.u32 %s335_s17, 4  ;;  %s1527_s19 = int_to_ptr.vmem [resolvable:$true] %s343_s19 }
  0x63   : > { %p1531_p11 = pnand %p965_p3, %p66_p5  ;;  %s332_s16 = scalar_lea.sflag [#allocation3], %s331_s8 }
  0x64   : > { %s1117_s7 = scalar_lea.hbm %s1525_s15, 128  ;;  %s1122_s18 = scalar_lea.hbm %s1719_s0, 256 }
  0x65   : > { %p1118_p9 = scmp.ne.s32.totalorder %s1525_s15, %s1117_s7  ;;  %p1119_p12 = pneg %p1531_p11 }
  0x66   : > { %p1123_p2 = scmp.lt.u32.totalorder %s1525_s15, %s1719_s0  ;;  %p1124_p4 = scmp.lt.u32.totalorder %s1122_s18, %s1117_s7 }
  0x67   : > { %p1120_p0 = pnand %p1119_p12, %p1118_p9  ;;  %p1126_p13 = scmp.lt.u32.totalorder %s1117_s7, %s1525_s15 }
  0x68   : > { %p1125_p8 = por %p1124_p4, %p1123_p2 }
  0x69   : > { %p1121_p1 = pneg %p1120_p0 }
  0x6a   : > { %p1127_p6 = por %p1126_p13, %p1125_p8 }
  0x6c   : > { %p1128_p3 = pnand %p1127_p6, %p1121_p1 }
  0x6e   : > { %1131 = shalt.err (!%p1128_p3)
}
  0x6f   : > { %s1132_s8 = scalar_lea.vmem %s1527_s19, 128  ;;  %s1304_s23 = smov [#allocation2]  }
  0x70   : > { %p1133_p5 = scmp.ne.s32.totalorder %s1527_s19, %s1132_s8  ;;  %s1137_s17 = sshll.u32 %s1304_s23, 4  ;;  %s1138_s17 = int_to_ptr.vmem [resolvable:$false] %s1137_s17 }
  0x71   : > { %s1139_s12 = scalar_lea.vmem %s1138_s17, 256  ;;  %p1140_p0 = scmp.lt.s32.totalorder %s1527_s19, %s1138_s17 }
  0x72   : > { %p1135_p7 = pnand %p1133_p5, %p1119_p12  ;;  %p1141_p2 = scmp.lt.s32.totalorder %s1139_s12, %s1132_s8 }
  0x74   : > { %p1136_p9 = pneg %p1135_p7  ;;  %p1142_p4 = por %p1141_p2, %p1140_p0 }
  0x76   : > { %p1143_p8 = pnand %p1142_p4, %p1136_p9 }
  0x78   : > { %1146 = shalt.err (!%p1143_p8)
}
  0x79   : > { %951 = dma.hbm_to_vmem [thread:$0]  (!%p1531_p11), %s1525_s15, 128, %s1527_s19, %s332_s16  }
  0x7a   : > { %p1745_p1 = scmp.ne.s32.totalorder %s1739_s11, 0 }
  0x7b   : > { %s1563_s7 = sand.u32 (!%p1745_p1), 1, %s1281_s25   ;;  %p1746_p12 = scmp.ne.s32.totalorder (!%p1745_p1), %s1736_s9, 0 }
  0x7c   : > { %352 = sbr.rel (%p1745_p1) target bundleno = 581 (0x245), region = 40  ;;  %s860_s10 = sshll.u32 (!%p1745_p1), %s1563_s7, 3 }
  0x7d   : > { %s355_s18 = scalar_lea.sflag (!%p1745_p1), [#allocation3], %s1563_s7  ;;  %s358_s20 = scalar_lea.vmem (!%p1745_p1), [#allocation2], %s860_s10 }
  0x83   : > { %1256 = dma.done.wait (%p1746_p12), %s355_s18, 128  }
  0x84   : > { %1258 = vsyncadd (%p1746_p12), %s355_s18, 4294967168  ;;  %p1747_p13 = scmp.eq.s32.totalorder %s1381_s30, 0 }
  0x86   : > { %1260 = dma.done.wait (%p1747_p13), [#allocation6], 512   ;;  %p1748_p11 = pmov %p1747_p13 }
  0x88   : > { %1262 = vsyncadd (%p1748_p11), [#allocation6], 4294966784  ;;  %p1749_p6 = pmov %p1748_p11 }
  0x8a   : > { %1264 = dma.done.wait (%p1749_p6), [#allocation9], 256   ;;  %p1750_p3 = pmov %p1749_p6 }
  0x8b   : > { %v412_v0 = vld [vmem:[%s358_s20] sm:$0xff]  ;;  %vm414_vm0 = vcmask 261120   ;;  %v1025_v3 = vld [vmem:[#allocation5] sm:$0xff]   ;;  %v1305_v5 = vmov 0.0   ;;  %v1027_v6 = vld [vmem:[#allocation5 + $0x8] sm:$0xff]   ;;  %vm1306_vm1 = vmmov 0  }
  0x8c   : > { %1266 = vsyncadd (%p1750_p3), [#allocation9], 4294967040  ;;  %v413_v1 = vmul.f32 %v412_v0, %v412_v0  ;;  %v1026_v4 = vld [vmem:[#allocation7] sm:$0xff]   ;;  %894 = vmatprep.subr.bf16.mxu0 %v1305_v5  ;;  %902 = vmatprep.subr.bf16.mxu1 %v1305_v5  ;;  %v1028_v7 = vld [vmem:[#allocation7 + $0x8] sm:$0xff]   ;;  %s1590_s15 = sshll.u32 %s1563_s7, 2  ;;  %s615_s19 = sand.u32 1, %s1381_s30  }
  0x8d   : > { %895 = vmatpush3.bf16.msra.mxu0 %v1025_v3  ;;  %903 = vmatpush3.bf16.msra.mxu1 %v1026_v4  ;;  %v867_v12 = vld [vmem:[%s1720_s1] ss:$0 sm:$0xff]  ;;  %v1029_v15 = vld [vmem:[#allocation8] sm:$0xff]   ;;  %v1030_v17 = vld [vmem:[#allocation8 + $0x8] sm:$0xff]   ;;  %s1594_s13 = sshll.u32 %s1289_s27, 6  ;;  %s403_s16 = scalar_lea.vmem [#allocation11], %s1590_s15 }
  0x8e   : > { %v415_v2 = vsel %vm414_vm0, %v413_v1, 0.0  ;;  %896 = vmatprep.subr.bf16.mxu0 %v1305_v5  ;;  %904 = vmatprep.subr.bf16.mxu1 %v1305_v5  ;;  %s651_s22 = sshll.u32 %s403_s16, 4  ;;  %s396_s8 = scalar_lea.vmem [#allocation10], %s1590_s15  ;;  %vm492_vm2 = vcmask 257024   ;;  %s1604_s22 = int_to_ptr.vmem [resolvable:$true] %s651_s22 }
  0x8f   : > { %416 = vadd.xlane.f32.xlu0 %v415_v2  ;;  %898 = vmatprep.mubr.msk.bf16.mxu0 %vm1306_vm1, %v1305_v5  ;;  %s636_s23 = sshll.u32 %s396_s8, 4  ;;  %s1602_s10 = scalar_lea.hbm %s1725_s6, %s1594_s13  ;;  %s1612_s23 = int_to_ptr.vmem [resolvable:$true] %s636_s23 }
  0x90   : > { %906 = vmatprep.mubr.msk.bf16.mxu1 %vm1306_vm1, %v1305_v5  ;;  %s1610_s18 = scalar_lea.hbm %s1724_s5, %s1594_s13  ;;  %s1616_s20 = scalar_lea.sflag [#allocation12], %s615_s19 }
  0x91   : > { %897 = vmatpush3.bf16.msra.mxu0 %v1027_v6  ;;  %905 = vmatpush3.bf16.msra.mxu1 %v1028_v7  ;;  %s1147_s9 = scalar_lea.vmem %s1604_s22, 64  ;;  %s1307_s11 = smov [#allocation11]  }
  0x92   : > { %910 = vmatprep.subr.bf16.mxu0 %v1305_v5  ;;  %p1148_p5 = scmp.ne.s32.totalorder %s1604_s22, %s1147_s9  ;;  %s1151_s17 = sshll.u32 %s1307_s11, 4  ;;  %s1152_s17 = int_to_ptr.vmem [resolvable:$false] %s1151_s17 }
  0x93   : > { %s1153_s12 = scalar_lea.vmem %s1152_s17, 128  ;;  %p1154_p0 = scmp.lt.s32.totalorder %s1604_s22, %s1152_s17 }
  0x94   : > { %p1149_p7 = pnand %p1148_p5, %p1508_p10  ;;  %p1155_p2 = scmp.lt.s32.totalorder %s1153_s12, %s1147_s9 }
  0x96   : > { %p1150_p9 = pneg %p1149_p7  ;;  %p1156_p4 = por %p1155_p2, %p1154_p0 }
  0x98   : > { %p1157_p8 = pnand %p1156_p4, %p1150_p9 }
 0x11c   : > { %v417_v8 = vpop.xlane.xlu0 %416 }
 0x11d   : > { %v419_v9 = vmul.f32 0.03125, %v417_v8 }
 0x11f   : > { %v420_v10 = vadd.f32 1e-05, %v419_v9 }
 0x121   : > { %1031 = vrsqrt.f32 %v420_v10 }
 0x12b   : > { %v1032_v11 = vpop.eup %1031 }
 0x12c   : > { %v422_v13 = vmul.f32 %v1032_v11, %v412_v0 }
 0x12e   : > { %v430_v14 = vmul.f32 %v867_v12, %v422_v13 }
 0x130   : > { %v431_v16 = vpack.c.bf16 %v430_v14, %v430_v14 }
 0x132   : > { %899 = vmatmul.mubr.msk.bf16.vlgmr.msra.gmra.mrb[0].mxu0 %vm414_vm0, %v431_v16  ;;  %907 = vmatmul.mubr.msk.bf16.vlgmr.msra.gmra.mrb[0].mxu1 %vm414_vm0, %v431_v16 }
 0x133   : > { %911 = vmatpush3.bf16.msra.mxu0 %v1029_v15  ;;  %914 = vmatprep.mubr.msk.bf16.mxu0 %vm1306_vm1, %v1305_v5 }
 0x134   : > { %912 = vmatprep.subr.bf16.mxu0 %v1305_v5 }
 0x137   : > { %913 = vmatpush3.bf16.msra.mxu0 %v1030_v17 }
 0x13a   : > { %915 = vmatmul.mubr.msk.bf16.vlgmr.msra.gmra.mrb[4].mxu0 %vm414_vm0, %v431_v16 }
 0x205   : > { %v485_v18 = vpop.f32.mrb[0].mxu0  ;;  %v544_v19 = vpop.f32.mrb[0].mxu1 }
 0x206   : > { %v491_v20 = vpack.c.bf16 %v485_v18, %v485_v18  ;;  %v550_v21 = vpack.c.bf16 %v544_v19, %v544_v19  ;;  %v900_v22 = vpop.f32.mrb[1].mxu0  ;;  %v908_v23 = vpop.f32.mrb[1].mxu1 }
 0x207   : > { %v488_v24 = vpop.f32.mrb[2].mxu0  ;;  %v547_v25 = vpop.f32.mrb[2].mxu1 }
 0x208   : > { %v901_v26 = vpop.f32.mrb[3].mxu0  ;;  %v909_v27 = vpop.f32.mrb[3].mxu1  ;;  %551 = vst.msk [vmem:[%s403_s16] sm:$0xf] %vm492_vm2, %v550_v21  ;;  %493 = vst.msk [vmem:[%s396_s8] sm:$0xf] %vm492_vm2, %v491_v20 }
 0x209   : > { %1160 = shalt.err (!%p1157_p8)
}
 0x20a   : > { %s1161_s19 = scalar_lea.hbm %s1602_s10, 64  ;;  %s1165_s27 = scalar_lea.hbm %s1725_s6, 128 }
 0x20b   : > { %p1162_p1 = scmp.ne.s32.totalorder %s1602_s10, %s1161_s19  ;;  %p1166_p11 = scmp.lt.u32.totalorder %s1602_s10, %s1725_s6 }
 0x20c   : > { %p1167_p6 = scmp.lt.u32.totalorder %s1165_s27, %s1161_s19  ;;  %p1169_p5 = scmp.lt.u32.totalorder %s1161_s19, %s1602_s10 }
 0x20d   : > { %p1163_p12 = pnand %p1162_p1, %p1508_p10 }
 0x20e   : > { %p1168_p3 = por %p1167_p6, %p1166_p11 }
 0x20f   : > { %p1164_p13 = pneg %p1163_p12 }
 0x210   : > { %p1170_p7 = por %p1169_p5, %p1168_p3 }
 0x212   : > { %p1171_p9 = pnand %p1170_p7, %p1164_p13 }
 0x214   : > { %1174 = shalt.err (!%p1171_p9)
}
 0x215   : > { %933 = dma.vmem_to_hbm [thread:$0]  (%p1508_p10), %s1604_s22, 64, %s1602_s10, %s1616_s20  }
 0x216   : > { %s611_s9 = scalar_lea.sflag [#allocation4], %s1563_s7  ;;  %s1175_s17 = scalar_lea.vmem %s1612_s23, 64 }
 0x217   : > { %p1176_p0 = scmp.ne.s32.totalorder %s1612_s23, %s1175_s17  ;;  %s1308_s12 = smov [#allocation10]  }
 0x218   : > { %s1179_s19 = sshll.u32 %s1308_s12, 4  ;;  %s1180_s19 = int_to_ptr.vmem [resolvable:$false] %s1179_s19 }
 0x219   : > { %p1177_p2 = pnand %p1176_p0, %p1508_p10  ;;  %s1181_s16 = scalar_lea.vmem %s1180_s19, 128 }
 0x21a   : > { %p1182_p8 = scmp.lt.s32.totalorder %s1612_s23, %s1180_s19  ;;  %p1183_p1 = scmp.lt.s32.totalorder %s1181_s16, %s1175_s17 }
 0x21b   : > { %p1178_p4 = pneg %p1177_p2 }
 0x21c   : > { %p1184_p12 = por %p1183_p1, %p1182_p8 }
 0x21e   : > { %p1185_p13 = pnand %p1184_p12, %p1178_p4 }
 0x220   : > { %1188 = shalt.err (!%p1185_p13)
}
 0x221   : > { %s1189_s7 = scalar_lea.hbm %s1610_s18, 64  ;;  %s1193_s8 = scalar_lea.hbm %s1724_s5, 128 }
 0x222   : > { %p1190_p11 = scmp.ne.s32.totalorder %s1610_s18, %s1189_s7  ;;  %p1194_p5 = scmp.lt.u32.totalorder %s1610_s18, %s1724_s5 }
 0x223   : > { %p1195_p7 = scmp.lt.u32.totalorder %s1193_s8, %s1189_s7  ;;  %p1197_p0 = scmp.lt.u32.totalorder %s1189_s7, %s1610_s18 }
 0x224   : > { %p1191_p6 = pnand %p1190_p11, %p1508_p10 }
 0x225   : > { %p1196_p9 = por %p1195_p7, %p1194_p5 }
 0x226   : > { %p1192_p3 = pneg %p1191_p6 }
 0x227   : > { %p1198_p2 = por %p1197_p0, %p1196_p9 }
 0x229   : > { %p1199_p4 = pnand %p1198_p2, %p1192_p3 }
 0x22b   : > { %1202 = shalt.err (!%p1199_p4)
}
 0x22c   : > { %932 = dma.vmem_to_hbm [thread:$0]  (%p1508_p10), %s1612_s23, 64, %s1610_s18, %s611_s9   ;;  %v602_v28 = vpop.f32.mrb[4].mxu0 }
 0x22d   : > { %s410_s11 = scalar_lea.vmem [#allocation13], %s1590_s15  ;;  %v608_v29 = vpack.c.bf16 %v602_v28, %v602_v28  ;;  %v916_v30 = vpop.f32.mrb[5].mxu0  ;;  %s1751_s16 = sld [smem:[#allocation21_spill]] }
 0x22e   : > { %s666_s17 = sshll.u32 %s410_s11, 4  ;;  %v605_v31 = vpop.f32.mrb[6].mxu0  ;;  %s1309_s15 = smov [#allocation13]   ;;  %s1669_s17 = int_to_ptr.vmem [resolvable:$true] %s666_s17 }
 0x22f   : > { %v917_v32 = vpop.f32.mrb[7].mxu0  ;;  %609 = vst.msk [vmem:[%s410_s11] sm:$0xf] %vm492_vm2, %v608_v29  ;;  %s1203_s23 = scalar_lea.vmem %s1669_s17, 64  ;;  %s1207_s18 = sshll.u32 %s1309_s15, 4  ;;  %s1208_s18 = int_to_ptr.vmem [resolvable:$false] %s1207_s18 }
 0x230   : > { %p1204_p8 = scmp.ne.s32.totalorder %s1669_s17, %s1203_s23  ;;  %s1209_s9 = scalar_lea.vmem %s1208_s18, 128 }
 0x231   : > { %p1210_p13 = scmp.lt.s32.totalorder %s1669_s17, %s1208_s18  ;;  %p1211_p11 = scmp.lt.s32.totalorder %s1209_s9, %s1203_s23 }
 0x232   : > { %p1205_p1 = pnand %p1204_p8, %p1508_p10 }
 0x233   : > { %s1667_s7 = scalar_lea.hbm %s1751_s16, %s1594_s13  ;;  %p1212_p6 = por %p1211_p11, %p1210_p13 }
 0x234   : > { %p1206_p12 = pneg %p1205_p1 }
 0x236   : > { %p1213_p3 = pnand %p1212_p6, %p1206_p12 }
 0x238   : > { %1216 = shalt.err (!%p1213_p3)
}
 0x239   : > { %s1217_s13 = scalar_lea.hbm %s1667_s7, 64  ;;  %s1221_s8 = scalar_lea.hbm %s1751_s16, 128 }
 0x23a   : > { %p1218_p5 = scmp.ne.s32.totalorder %s1667_s7, %s1217_s13  ;;  %p1222_p0 = scmp.lt.u32.totalorder %s1667_s7, %s1751_s16 }
 0x23b   : > { %p1223_p2 = scmp.lt.u32.totalorder %s1221_s8, %s1217_s13  ;;  %p1225_p8 = scmp.lt.u32.totalorder %s1217_s13, %s1667_s7 }
 0x23c   : > { %p1219_p7 = pnand %p1218_p5, %p1508_p10 }
 0x23d   : > { %p1224_p4 = por %p1223_p2, %p1222_p0 }
 0x23e   : > { %p1220_p9 = pneg %p1219_p7 }
 0x23f   : > { %p1226_p1 = por %p1225_p8, %p1224_p4 }
 0x241   : > { %p1227_p12 = pnand %p1226_p1, %p1220_p9 }
 0x243   : > { %1230 = shalt.err (!%p1227_p12)
}
 0x244   : > { %934 = dma.vmem_to_hbm [thread:$0]  (%p1508_p10), %s1669_s17, 64, %s1667_s7, %s1616_s20  }
 0x245 PF: > { %s1752_s11 = sld [smem:[#allocation19_spill]]  ;;  %s1753_s12 = sld [smem:[#allocation20_spill]] }
 0x246   : > { %p1755_p11 = scmp.ge.s32.totalorder %s1297_s29, 2 }
 0x24b   : > { %s678_s19 = sand.u32 1, %s1752_s11   ;;  %p1754_p13 = scmp.ne.s32.totalorder %s1753_s12, 0 }
 0x24c   : > { %s679_s23 = scalar_lea.sflag [#allocation4], %s678_s19 }
 0x24d   : > { %p953_p6 = pnand %p1755_p11, %p1754_p13 }
 0x24f   : > { %1268 = dma.done.wait (!%p953_p6), %s679_s23, 64  }
 0x250   : > { %1270 = vsyncadd (!%p953_p6), %s679_s23, 4294967232  ;;  %s1756_s15 = sadd.s32 4294967294, %s1297_s29  }
 0x251   : > { %s687_s18 = sand.u32 1, %s1756_s15  }
 0x252   : > { %s688_s9 = scalar_lea.sflag [#allocation12], %s687_s18 }
 0x253   : > { %1272 = dma.done.wait (!%p953_p6), %s688_s9, 128  }
 0x254   : > { %1274 = vsyncadd (!%p953_p6), %s688_s9, 4294967168  ;;  %s29_s29 = sadd.s32 1, %s1297_s29   ;;  %s1757_s24 = smov %s1281_s25 }
 0x255   : > { %p26_p10 = scmp.ge.s32.totalorder %s29_s29, 4   ;;  %s1758_s25 = smov %s1285_s26 }
 0x256   : > { %s1759_s26 = smov %s1520_s21  ;;  %s1760_s27 = smov %s1293_s28 }
 0x257   : > { %s1761_s28 = smov %s1763_s14  ;;  %28 = sbr.rel (!%p26_p10) target bundleno = 12 (0xc), region = 132 }
 0x25e   :  { %702 = vsyncpa [#allocation3], 1 }
 0x25f   :  { %704 = vsyncpa [#allocation3 + $0x1], 1 }
 0x260   :  { %705 = vsyncpa [#allocation6], 1 }
 0x261   :  { %706 = vsyncpa [#allocation9], 1 }
 0x262   :  { %707 = vsyncpa [#allocation4], 1 }
 0x263   :  { %709 = vsyncpa [#allocation4 + $0x1], 1 }
 0x264   :  { %710 = vsyncpa [#allocation12], 1 }
 0x265   :  { %712 = vsyncpa [#allocation12 + $0x1], 1 }

</bundles_post_ra>
